<compile_context>
chip_gen: v5e
topology: v5e:2x2
jax: 0.10.0
libtpu: 0.0.40
codegen_flags: <defaults>
</compile_context>

<pallas_src>
import math
import functools

import jax
import jax.numpy as jnp
from jax import lax
from jax.experimental import pallas as pl
from jax.experimental.pallas import tpu as pltpu


def _round_up(x, m):
    return ((x + m - 1) // m) * m


def _largest_divisor_leq(n, cap):
    cap = max(1, min(n, cap))
    for d in range(cap, 0, -1):
        if n % d == 0:
            return d
    return 1


def _attention_kernel(q_ref, k_ref, bias_ref, scale_ref,
                      wq_ref, bq_ref, wk_ref, bk_ref, wv_ref, bv_ref,
                      out_ref, score_ref, kp_ref, vp_ref, *, lk_real):
    """One grid step = (Bt batch elements) x (one Lq tile). All tiles in VMEM."""
    Bt, tq, Qd = q_ref.shape
    _, Lkp, Kd = k_ref.shape
    H = wq_ref.shape[1]
    Od = wv_ref.shape[1]

    # ---- K / V projections: once per batch tile (hoisted off the qi axis) ----
    @pl.when(pl.program_id(1) == 0)
    def _():
        k2 = k_ref[...].reshape(Bt * Lkp, Kd)                      # bf16
        k_proj = jnp.dot(k2, wk_ref[...],
                         preferred_element_type=jnp.float32) + bk_ref[...]
        # reference quirk: values() applied to the projected key
        v = jnp.dot(k_proj.astype(jnp.bfloat16), wv_ref[...],
                    preferred_element_type=jnp.float32) + bv_ref[...]
        kp_ref[...] = k_proj.reshape(Bt, Lkp, H).astype(jnp.bfloat16)
        vp_ref[...] = v.reshape(Bt, Lkp, Od).astype(jnp.bfloat16)

    # ---- Q projection for this (batch, query) tile ----
    q2 = q_ref[...].reshape(Bt * tq, Qd)                           # bf16
    q_proj = jnp.dot(q2, wq_ref[...],
                     preferred_element_type=jnp.float32) + bq_ref[...]
    qp = q_proj.reshape(Bt, tq, H).astype(jnp.bfloat16)

    # ---- scaled dot-product scores + additive mask bias ----
    s = jnp.einsum('bqh,bkh->bqk', qp, kp_ref[...],
                   preferred_element_type=jnp.float32)             # (Bt, tq, Lkp) f32
    # scale_ref is 1/sqrt(H) * [row has any unmasked key]; bias is 0 / -1e9.
    # This reproduces masked_fill(-1e9) exactly (masked exps underflow to 0) and
    # also matches the reference's uniform softmax for fully-masked rows.
    s = s * scale_ref[...] + bias_ref[...]

    # ---- numerically stable softmax over the key axis (f32, VPU/EUP) ----
    m = jnp.max(s, axis=-1, keepdims=True)
    e = jnp.exp(s - m)
    if lk_real != Lkp:
        # lane-padding columns must never enter the denominator
        col = lax.broadcasted_iota(jnp.int32, e.shape, 2)
        e = jnp.where(col < lk_real, e, jnp.float32(0.0))
    denom = jnp.sum(e, axis=-1, keepdims=True)
    p = e * pl.reciprocal(denom, approx=True)

    out = jnp.einsum('bqk,bko->bqo', p.astype(jnp.bfloat16), vp_ref[...],
                     preferred_element_type=jnp.float32)           # (Bt, tq, Od)

    out_ref[...] = out.astype(out_ref.dtype)
    score_ref[...] = p.astype(score_ref.dtype)


def attention_forward(key, query, mask, params, score_dtype=jnp.float32):
    """Mirrors Attention.forward. `params` holds wq,bq,wk,bk,wv,bv with weights
    stored as (in_features, out_features)."""
    # PyTorch-style shape coercion
    if query.ndim == 1:
        query = query[None, :]
    if key.ndim == 1:
        key = key[None, :]
    if query.ndim == 2:
        query = query[:, None, :]
    if key.ndim == 2:
        key = key[:, None, :]

    B, Lq, Qd = query.shape
    Bk, Lk, Kd = key.shape
    assert B == Bk
    H = params["wq"].shape[1]
    Od = params["wv"].shape[1]

    if mask is None:
        mask = jnp.ones((B, Lk), jnp.float32)
    mask = mask.astype(jnp.float32)

    # ---------------- tiling heuristics ----------------
    Lk_pad = _round_up(Lk, 128)            # lane-dense score tiles / stores
    TQ_ALIGN = 16                          # bf16 sublane packing for the q tile
    score_isz = jnp.dtype(score_dtype).itemsize

    def footprint(bt, t):
        # double-buffered inputs (bf16 q/k, f32 bias/scale) + weights
        in_b = 2 * (bt * t * Qd * 2 + bt * Lk_pad * Kd * 2 + bt * Lk_pad * 4 + bt * 4)
        wgt_b = 2 * ((Qd * H + Kd * H + H * Od) * 2 + (2 * H + Od) * 4)
        # double-buffered outputs
        out_b = 2 * (bt * t * Od * 4 + bt * t * Lk_pad * score_isz)
        # persistent K/V scratch (bf16)
        scr_b = bt * Lk_pad * (H + Od) * 2
        # f32 score / exp / prob intermediates (estimate)
        tmp_b = 4 * bt * t * Lk_pad * 4
        return in_b + wgt_b + out_b + scr_b + tmp_b

    tq_cap = 256 if Lk_pad >= 2048 else 512       # keep v7x (64 MiB VMEM) safe
    tq = min(_round_up(Lq, TQ_ALIGN), tq_cap)
    Bt = _largest_divisor_leq(B, max(1, 1024 // tq))   # ~512-1024 rows / step

    BUDGET = 24 * 1024 * 1024                     # conservative across v5e/v6e/v7x
    while footprint(Bt, tq) > BUDGET and (Bt > 1 or tq > TQ_ALIGN):
        if Bt > 1:
            Bt = _largest_divisor_leq(B, max(1, Bt // 2))
        else:
            tq = max(TQ_ALIGN, _round_up(tq // 2, TQ_ALIGN))

    # guarantee >= 2 grid steps when possible so both v7x TensorCores get work
    if (B // Bt) * (_round_up(Lq, tq) // tq) == 1:
        if Bt > 1:
            Bt = _largest_divisor_leq(B, max(1, Bt // 2))
        elif tq > TQ_ALIGN:
            tq = max(TQ_ALIGN, _round_up(tq // 2, TQ_ALIGN))

    Lq_pad = _round_up(Lq, tq)
    nq = Lq_pad // tq
    nb = B // Bt                                  # Bt divides B -> no batch padding
    inv_sqrt_h = jnp.float32(1.0 / math.sqrt(H))

    # ---------------- input preparation (wrapper-side, XLA) ----------------
    # bf16 q/k: halves the dominant HBM->VMEM read traffic; math stays f32 inside.
    q_p = jnp.zeros((B, Lq_pad, Qd), jnp.bfloat16).at[:, :Lq, :].set(
        query.astype(jnp.bfloat16))
    k_p = jnp.zeros((B, Lk_pad, Kd), jnp.bfloat16).at[:, :Lk, :].set(
        key.astype(jnp.bfloat16))

    # additive mask bias (0 keep / -1e9 masked; padded key columns masked) and
    # per-batch score scale (zeroed when a row is fully masked -> uniform softmax,
    # matching the reference semantics exactly).
    neg = jnp.float32(-1.0e9)
    bias = jnp.full((B, 1, Lk_pad), neg, jnp.float32)
    bias = bias.at[:, 0, :Lk].set(
        jnp.where(mask == 0.0, neg, jnp.float32(0.0)))
    row_keep = jnp.any(mask != 0.0, axis=-1, keepdims=True).astype(jnp.float32)
    scale = (row_keep * inv_sqrt_h).reshape(B, 1, 1)

    wq = params["wq"].astype(jnp.bfloat16)
    wk = params["wk"].astype(jnp.bfloat16)
    wv = params["wv"].astype(jnp.bfloat16)        # (H, Od): V_dim must equal hidden_dim
    bq = params["bq"].reshape(1, H).astype(jnp.float32)
    bk = params["bk"].reshape(1, H).astype(jnp.float32)
    bv = params["bv"].reshape(1, Od).astype(jnp.float32)

    # ---------------- pallas_call ----------------
    grid = (nb, nq)
    out_shapes = (
        jax.ShapeDtypeStruct((B, Lq_pad, Od), jnp.float32),
        jax.ShapeDtypeStruct((B, Lq_pad, Lk_pad), score_dtype),
    )
    in_specs = [
        pl.BlockSpec((Bt, tq, Qd),     lambda b, qi: (b, qi, 0)),   # query (bf16)
        pl.BlockSpec((Bt, Lk_pad, Kd), lambda b, qi: (b, 0, 0)),    # key   (bf16)
        pl.BlockSpec((Bt, 1, Lk_pad),  lambda b, qi: (b, 0, 0)),    # mask bias (f32)
        pl.BlockSpec((Bt, 1, 1),       lambda b, qi: (b, 0, 0)),    # per-batch scale
        pl.BlockSpec((Qd, H),          lambda b, qi: (0, 0)),       # wq
        pl.BlockSpec((1, H),           lambda b, qi: (0, 0)),       # bq
        pl.BlockSpec((Kd, H),          lambda b, qi: (0, 0)),       # wk
        pl.BlockSpec((1, H),           lambda b, qi: (0, 0)),       # bk
        pl.BlockSpec((H, Od),          lambda b, qi: (0, 0)),       # wv
        pl.BlockSpec((1, Od),          lambda b, qi: (0, 0)),       # bv
    ]
    out_specs = (
        pl.BlockSpec((Bt, tq, Od),     lambda b, qi: (b, qi, 0)),
        pl.BlockSpec((Bt, tq, Lk_pad), lambda b, qi: (b, qi, 0)),
    )
    scratch_shapes = [
        pltpu.VMEM((Bt, Lk_pad, H), jnp.bfloat16),   # projected K (reused over qi)
        pltpu.VMEM((Bt, Lk_pad, Od), jnp.bfloat16),  # projected V (reused over qi)
    ]

    est = footprint(Bt, tq)
    vmem_limit = int(min(100 * 1024 * 1024,
                         max(32 * 1024 * 1024, int(est * 1.75))))

    fn = pl.pallas_call(
        functools.partial(_attention_kernel, lk_real=Lk),
        out_shape=out_shapes,
        grid_spec=pltpu.PrefetchScalarGridSpec(
            num_scalar_prefetch=0,
            grid=grid,
            in_specs=in_specs,
            out_specs=out_specs,
            scratch_shapes=scratch_shapes,
        ),
        compiler_params=pltpu.CompilerParams(
            # qi must stay sequential per batch tile (K/V scratch reuse);
            # the batch axis is megacore-parallel.
            dimension_semantics=("parallel", "arbitrary"),
            vmem_limit_bytes=vmem_limit,
        ),
    )
    out_p, score_p = fn(q_p, k_p, bias, scale, wq, bq, wk, bk, wv, bv)
    # slice the padding back off
    return out_p[:, :Lq, :], score_p[:, :Lq, :Lk]


def _reference(key, query, mask, params):
    qp = query @ params["wq"] + params["bq"]
    kp = key @ params["wk"] + params["bk"]
    v = kp @ params["wv"] + params["bv"]
    sc = jnp.einsum("bqh,bkh->bqk", qp, kp) / math.sqrt(params["wq"].shape[1])
    sc = jnp.where(mask[:, None, :] == 0.0, -1.0e9, sc)
    p = jax.nn.softmax(sc, axis=-1)
    return jnp.einsum("bqk,bko->bqo", p, v), p


if __name__ == "__main__":
    B, Lq, Lk, D = 2, 8, 8, 32   # Q_dim = K_dim = V_dim = hidden_dim = O_dim = 32

    root = jax.random.PRNGKey(0)
    ks = jax.random.split(root, 9)

    key_in = jax.random.normal(ks[0], (B, Lk, D), jnp.float32)
    query_in = jax.random.normal(ks[1], (B, Lq, D), jnp.float32)
    mask = (jax.random.uniform(ks[2], (B, Lk)) > 0.2).astype(jnp.float32)

    bound = 1.0 / math.sqrt(D)
    params = {
        # stored as (in_features, out_features)
        "wq": jax.random.uniform(ks[3], (D, D), jnp.float32, -bound, bound),
        "bq": jax.random.uniform(ks[4], (D,), jnp.float32, -bound, bound),
        "wk": jax.random.uniform(ks[5], (D, D), jnp.float32, -bound, bound),
        "bk": jax.random.uniform(ks[6], (D,), jnp.float32, -bound, bound),
        "wv": jax.random.uniform(ks[7], (D, D), jnp.float32, -bound, bound),
        "bv": jax.random.uniform(ks[8], (D,), jnp.float32, -bound, bound),
    }

    out, score = attention_forward(key_in, query_in, mask, params)
    out, score = jax.block_until_ready((out, score))

    ref_out, ref_score = _reference(key_in, query_in, mask, params)
    # tolerances account for bf16 MXU operands + approx EUP reciprocal
    assert out.shape == ref_out.shape and score.shape == ref_score.shape
    assert jnp.allclose(out, ref_out, atol=2e-2, rtol=2e-2)
    assert jnp.allclose(score, ref_score, atol=2e-2, rtol=2e-2)

    print("KERNEL_OK")
</pallas_src>

<mosaic_0001>
module attributes {stable_mosaic.version = 11 : i64} {
  func.func @_attention_kernel(%arg0: i32, %arg1: i32, %arg2: memref<1x16x32xbf16, #tpu.memory_space<vmem>>, %arg3: memref<1x128x32xbf16, #tpu.memory_space<vmem>>, %arg4: memref<1x1x128xf32, #tpu.memory_space<vmem>>, %arg5: memref<1x1x1xf32, #tpu.memory_space<vmem>>, %arg6: memref<32x32xbf16, #tpu.memory_space<vmem>>, %arg7: memref<1x32xf32, #tpu.memory_space<vmem>>, %arg8: memref<32x32xbf16, #tpu.memory_space<vmem>>, %arg9: memref<1x32xf32, #tpu.memory_space<vmem>>, %arg10: memref<32x32xbf16, #tpu.memory_space<vmem>>, %arg11: memref<1x32xf32, #tpu.memory_space<vmem>>, %arg12: memref<1x16x32xf32, #tpu.memory_space<vmem>>, %arg13: memref<1x16x128xf32, #tpu.memory_space<vmem>>, %arg14: memref<1x128x32xbf16, #tpu.memory_space<vmem>>, %arg15: memref<1x128x32xbf16, #tpu.memory_space<vmem>>) attributes {dimension_semantics = [#tpu.dimension_semantics<parallel>, #tpu.dimension_semantics<arbitrary>], iteration_bounds = array<i64: 2, 1>, scalar_prefetch = 0 : i64, scratch_operands = 2 : i64, tpu.core_type = #tpu.core_type<tc>, window_params = [{transform_indices = @transform_0, window_bounds = array<i64: 1, 16, 32>}, {transform_indices = @transform_1, window_bounds = array<i64: 1, 128, 32>}, {transform_indices = @transform_2, window_bounds = array<i64: 1, 1, 128>}, {transform_indices = @transform_3, window_bounds = array<i64: 1, 1, 1>}, {pipeline_mode = #tpu.pipeline_mode<synchronous>, transform_indices = @transform_4, window_bounds = array<i64: 32, 32>}, {pipeline_mode = #tpu.pipeline_mode<synchronous>, transform_indices = @transform_5, window_bounds = array<i64: 1, 32>}, {pipeline_mode = #tpu.pipeline_mode<synchronous>, transform_indices = @transform_6, window_bounds = array<i64: 32, 32>}, {pipeline_mode = #tpu.pipeline_mode<synchronous>, transform_indices = @transform_7, window_bounds = array<i64: 1, 32>}, {pipeline_mode = #tpu.pipeline_mode<synchronous>, transform_indices = @transform_8, window_bounds = array<i64: 32, 32>}, {pipeline_mode = #tpu.pipeline_mode<synchronous>, transform_indices = @transform_9, window_bounds = array<i64: 1, 32>}, {transform_indices = @transform_10, window_bounds = array<i64: 1, 16, 32>}, {transform_indices = @transform_11, window_bounds = array<i64: 1, 16, 128>}]} {
    %c0_i32 = arith.constant 0 : i32
    %0 = arith.cmpi eq, %arg1, %c0_i32 : i32
    %1 = arith.extui %0 : i1 to i32
    %c0_i32_0 = arith.constant 0 : i32
    %2 = arith.cmpi ne, %1, %c0_i32_0 : i32
    scf.if %2 {
      %c0_30 = arith.constant 0 : index
      %c0_31 = arith.constant 0 : index
      %c0_32 = arith.constant 0 : index
      %40 = vector.load %arg3[%c0_30, %c0_31, %c0_32] : memref<1x128x32xbf16, #tpu.memory_space<vmem>>, vector<1x128x32xbf16>
      %41 = vector.shape_cast %40 : vector<1x128x32xbf16> to vector<128x32xbf16>
      %c0_33 = arith.constant 0 : index
      %c0_34 = arith.constant 0 : index
      %42 = vector.load %arg8[%c0_33, %c0_34] : memref<32x32xbf16, #tpu.memory_space<vmem>>, vector<32x32xbf16>
      %cst_35 = arith.constant dense<0.000000e+00> : vector<128x32xf32>
      %43 = tpu.matmul %41, %42, %cst_35 {dimension_numbers = #tpu.dot_dimension_numbers<[1], [0], [0], [1], [0, 0, 1, 1], [], []>} : vector<128x32xbf16>, vector<32x32xbf16>, vector<128x32xf32> -> vector<128x32xf32>
      %c0_36 = arith.constant 0 : index
      %c0_37 = arith.constant 0 : index
      %44 = vector.load %arg9[%c0_36, %c0_37] : memref<1x32xf32, #tpu.memory_space<vmem>>, vector<1x32xf32>
      %45 = vector.broadcast %44 : vector<1x32xf32> to vector<128x32xf32>
      %46 = arith.addf %43, %45 : vector<128x32xf32>
      %47 = arith.truncf %46 : vector<128x32xf32> to vector<128x32xbf16>
      %c0_38 = arith.constant 0 : index
      %c0_39 = arith.constant 0 : index
      %48 = vector.load %arg10[%c0_38, %c0_39] : memref<32x32xbf16, #tpu.memory_space<vmem>>, vector<32x32xbf16>
      %cst_40 = arith.constant dense<0.000000e+00> : vector<128x32xf32>
      %49 = tpu.matmul %47, %48, %cst_40 {dimension_numbers = #tpu.dot_dimension_numbers<[1], [0], [0], [1], [0, 0, 1, 1], [], []>} : vector<128x32xbf16>, vector<32x32xbf16>, vector<128x32xf32> -> vector<128x32xf32>
      %c0_41 = arith.constant 0 : index
      %c0_42 = arith.constant 0 : index
      %50 = vector.load %arg11[%c0_41, %c0_42] : memref<1x32xf32, #tpu.memory_space<vmem>>, vector<1x32xf32>
      %51 = vector.broadcast %50 : vector<1x32xf32> to vector<128x32xf32>
      %52 = arith.addf %49, %51 : vector<128x32xf32>
      %53 = vector.shape_cast %46 : vector<128x32xf32> to vector<1x128x32xf32>
      %54 = arith.truncf %53 : vector<1x128x32xf32> to vector<1x128x32xbf16>
      %c0_43 = arith.constant 0 : index
      %c0_44 = arith.constant 0 : index
      %c0_45 = arith.constant 0 : index
      %55 = vector.load %arg14[%c0_43, %c0_44, %c0_45] : memref<1x128x32xbf16, #tpu.memory_space<vmem>>, vector<1x128x32xbf16>
      tpu.vector_store %arg14[%c0_43, %c0_44, %c0_45], %54 {strides = array<i32>} : memref<1x128x32xbf16, #tpu.memory_space<vmem>>, vector<1x128x32xbf16>,
      %56 = vector.shape_cast %52 : vector<128x32xf32> to vector<1x128x32xf32>
      %57 = arith.truncf %56 : vector<1x128x32xf32> to vector<1x128x32xbf16>
      %c0_46 = arith.constant 0 : index
      %c0_47 = arith.constant 0 : index
      %c0_48 = arith.constant 0 : index
      %58 = vector.load %arg15[%c0_46, %c0_47, %c0_48] : memref<1x128x32xbf16, #tpu.memory_space<vmem>>, vector<1x128x32xbf16>
      tpu.vector_store %arg15[%c0_46, %c0_47, %c0_48], %57 {strides = array<i32>} : memref<1x128x32xbf16, #tpu.memory_space<vmem>>, vector<1x128x32xbf16>,
    } else {
    }
    %c0 = arith.constant 0 : index
    %c0_1 = arith.constant 0 : index
    %c0_2 = arith.constant 0 : index
    %3 = vector.load %arg2[%c0, %c0_1, %c0_2] : memref<1x16x32xbf16, #tpu.memory_space<vmem>>, vector<1x16x32xbf16>
    %4 = vector.shape_cast %3 : vector<1x16x32xbf16> to vector<16x32xbf16>
    %c0_3 = arith.constant 0 : index
    %c0_4 = arith.constant 0 : index
    %5 = vector.load %arg6[%c0_3, %c0_4] : memref<32x32xbf16, #tpu.memory_space<vmem>>, vector<32x32xbf16>
    %cst = arith.constant dense<0.000000e+00> : vector<16x32xf32>
    %6 = tpu.matmul %4, %5, %cst {dimension_numbers = #tpu.dot_dimension_numbers<[1], [0], [0], [1], [0, 0, 1, 1], [], []>} : vector<16x32xbf16>, vector<32x32xbf16>, vector<16x32xf32> -> vector<16x32xf32>
    %c0_5 = arith.constant 0 : index
    %c0_6 = arith.constant 0 : index
    %7 = vector.load %arg7[%c0_5, %c0_6] : memref<1x32xf32, #tpu.memory_space<vmem>>, vector<1x32xf32>
    %8 = vector.broadcast %7 : vector<1x32xf32> to vector<16x32xf32>
    %9 = arith.addf %6, %8 : vector<16x32xf32>
    %10 = vector.shape_cast %9 : vector<16x32xf32> to vector<1x16x32xf32>
    %11 = arith.truncf %10 : vector<1x16x32xf32> to vector<1x16x32xbf16>
    %c0_7 = arith.constant 0 : index
    %c0_8 = arith.constant 0 : index
    %c0_9 = arith.constant 0 : index
    %12 = vector.load %arg14[%c0_7, %c0_8, %c0_9] : memref<1x128x32xbf16, #tpu.memory_space<vmem>>, vector<1x128x32xbf16>
    "tpu.trace_start"() <{level = 10 : i32, message = "bqh,bkh->bqk"}> : () -> ()
    %cst_10 = arith.constant dense<0.000000e+00> : vector<1x16x128xf32>
    %13 = tpu.matmul %11, %12, %cst_10 {dimension_numbers = #tpu.dot_dimension_numbers<[2], [2], [1], [1], [0, 0, 0, 1, 1, 1], [0], [0]>} : vector<1x16x32xbf16>, vector<1x128x32xbf16>, vector<1x16x128xf32> -> vector<1x16x128xf32>
    "tpu.trace_stop"() : () -> ()
    %c0_11 = arith.constant 0 : index
    %c0_12 = arith.constant 0 : index
    %c0_13 = arith.constant 0 : index
    %14 = vector.load %arg5[%c0_11, %c0_12, %c0_13] : memref<1x1x1xf32, #tpu.memory_space<vmem>>, vector<1x1x1xf32>
    %15 = vector.broadcast %14 : vector<1x1x1xf32> to vector<1x16x128xf32>
    %16 = arith.mulf %13, %15 : vector<1x16x128xf32>
    %c0_14 = arith.constant 0 : index
    %c0_15 = arith.constant 0 : index
    %c0_16 = arith.constant 0 : index
    %17 = vector.load %arg4[%c0_14, %c0_15, %c0_16] : memref<1x1x128xf32, #tpu.memory_space<vmem>>, vector<1x1x128xf32>
    %18 = vector.broadcast %17 : vector<1x1x128xf32> to vector<1x16x128xf32>
    %19 = arith.addf %16, %18 : vector<1x16x128xf32>
    %cst_17 = arith.constant dense<0xFF800000> : vector<1x16xf32>
    %20 = vector.multi_reduction <maximumf>, %19, %cst_17 [2] : vector<1x16x128xf32> to vector<1x16xf32>
    %21 = vector.shape_cast %20 : vector<1x16xf32> to vector<1x16x1xf32>
    %22 = vector.broadcast %21 : vector<1x16x1xf32> to vector<1x16x128xf32>
    %23 = arith.subf %19, %22 : vector<1x16x128xf32>
    %24 = math.exp %23 : vector<1x16x128xf32>
    %25 = tpu.iota {dimensions = array<i32: 2>} : vector<1x16x128xi32>
    %c8_i32 = arith.constant 8 : i32
    %26 = vector.broadcast %c8_i32 : i32 to vector<1x16x128xi32>
    %27 = arith.cmpi slt, %25, %26 : vector<1x16x128xi32>
    %cst_18 = arith.constant 0.000000e+00 : f32
    %28 = vector.broadcast %cst_18 : f32 to vector<1x16x128xf32>
    %29 = arith.select %27, %24, %28 : vector<1x16x128xi1>, vector<1x16x128xf32>
    %cst_19 = arith.constant dense<0.000000e+00> : vector<1x16xf32>
    %30 = vector.multi_reduction <add>, %29, %cst_19 [2] : vector<1x16x128xf32> to vector<1x16xf32>
    %31 = vector.shape_cast %30 : vector<1x16xf32> to vector<1x16x1xf32>
    %32 = tpu.reciprocal %31 {approx = true} : vector<1x16x1xf32> -> vector<1x16x1xf32>
    %33 = vector.broadcast %32 : vector<1x16x1xf32> to vector<1x16x128xf32>
    %34 = arith.mulf %29, %33 : vector<1x16x128xf32>
    %35 = arith.truncf %34 : vector<1x16x128xf32> to vector<1x16x128xbf16>
    %c0_20 = arith.constant 0 : index
    %c0_21 = arith.constant 0 : index
    %c0_22 = arith.constant 0 : index
    %36 = vector.load %arg15[%c0_20, %c0_21, %c0_22] : memref<1x128x32xbf16, #tpu.memory_space<vmem>>, vector<1x128x32xbf16>
    "tpu.trace_start"() <{level = 10 : i32, message = "bqk,bko->bqo"}> : () -> ()
    %cst_23 = arith.constant dense<0.000000e+00> : vector<1x16x32xf32>
    %37 = tpu.matmul %35, %36, %cst_23 {dimension_numbers = #tpu.dot_dimension_numbers<[2], [1], [1], [2], [0, 0, 0, 1, 1, 2], [0], [0]>} : vector<1x16x128xbf16>, vector<1x128x32xbf16>, vector<1x16x32xf32> -> vector<1x16x32xf32>
    "tpu.trace_stop"() : () -> ()
    %c0_24 = arith.constant 0 : index
    %c0_25 = arith.constant 0 : index
    %c0_26 = arith.constant 0 : index
    %38 = vector.load %arg12[%c0_24, %c0_25, %c0_26] : memref<1x16x32xf32, #tpu.memory_space<vmem>>, vector<1x16x32xf32>
    tpu.vector_store %arg12[%c0_24, %c0_25, %c0_26], %37 {strides = array<i32>} : memref<1x16x32xf32, #tpu.memory_space<vmem>>, vector<1x16x32xf32>,
    %c0_27 = arith.constant 0 : index
    %c0_28 = arith.constant 0 : index
    %c0_29 = arith.constant 0 : index
    %39 = vector.load %arg13[%c0_27, %c0_28, %c0_29] : memref<1x16x128xf32, #tpu.memory_space<vmem>>, vector<1x16x128xf32>
    tpu.vector_store %arg13[%c0_27, %c0_28, %c0_29], %34 {strides = array<i32>} : memref<1x16x128xf32, #tpu.memory_space<vmem>>, vector<1x16x128xf32>,
    return
  }
  func.func @transform_0(%arg0: i32, %arg1: i32) -> (i32, i32, i32) {
    %c0_i32 = arith.constant 0 : i32
    %c0_i32_0 = arith.constant 0 : i32
    return %arg0, %arg1, %c0_i32 : i32, i32, i32
  }
  func.func @transform_1(%arg0: i32, %arg1: i32) -> (i32, i32, i32) {
    %c0_i32 = arith.constant 0 : i32
    %c0_i32_0 = arith.constant 0 : i32
    %c0_i32_1 = arith.constant 0 : i32
    return %arg0, %c0_i32, %c0_i32_0 : i32, i32, i32
  }
  func.func @transform_2(%arg0: i32, %arg1: i32) -> (i32, i32, i32) {
    %c0_i32 = arith.constant 0 : i32
    %c0_i32_0 = arith.constant 0 : i32
    %c0_i32_1 = arith.constant 0 : i32
    return %arg0, %c0_i32, %c0_i32_0 : i32, i32, i32
  }
  func.func @transform_3(%arg0: i32, %arg1: i32) -> (i32, i32, i32) {
    %c0_i32 = arith.constant 0 : i32
    %c0_i32_0 = arith.constant 0 : i32
    %c0_i32_1 = arith.constant 0 : i32
    return %arg0, %c0_i32, %c0_i32_0 : i32, i32, i32
  }
  func.func @transform_4(%arg0: i32, %arg1: i32) -> (i32, i32) {
    %c0_i32 = arith.constant 0 : i32
    %c0_i32_0 = arith.constant 0 : i32
    %c0_i32_1 = arith.constant 0 : i32
    return %c0_i32, %c0_i32_0 : i32, i32
  }
  func.func @transform_5(%arg0: i32, %arg1: i32) -> (i32, i32) {
    %c0_i32 = arith.constant 0 : i32
    %c0_i32_0 = arith.constant 0 : i32
    %c0_i32_1 = arith.constant 0 : i32
    return %c0_i32, %c0_i32_0 : i32, i32
  }
  func.func @transform_6(%arg0: i32, %arg1: i32) -> (i32, i32) {
    %c0_i32 = arith.constant 0 : i32
    %c0_i32_0 = arith.constant 0 : i32
    %c0_i32_1 = arith.constant 0 : i32
    return %c0_i32, %c0_i32_0 : i32, i32
  }
  func.func @transform_7(%arg0: i32, %arg1: i32) -> (i32, i32) {
    %c0_i32 = arith.constant 0 : i32
    %c0_i32_0 = arith.constant 0 : i32
    %c0_i32_1 = arith.constant 0 : i32
    return %c0_i32, %c0_i32_0 : i32, i32
  }
  func.func @transform_8(%arg0: i32, %arg1: i32) -> (i32, i32) {
    %c0_i32 = arith.constant 0 : i32
    %c0_i32_0 = arith.constant 0 : i32
    %c0_i32_1 = arith.constant 0 : i32
    return %c0_i32, %c0_i32_0 : i32, i32
  }
  func.func @transform_9(%arg0: i32, %arg1: i32) -> (i32, i32) {
    %c0_i32 = arith.constant 0 : i32
    %c0_i32_0 = arith.constant 0 : i32
    %c0_i32_1 = arith.constant 0 : i32
    return %c0_i32, %c0_i32_0 : i32, i32
  }
  func.func @transform_10(%arg0: i32, %arg1: i32) -> (i32, i32, i32) {
    %c0_i32 = arith.constant 0 : i32
    %c0_i32_0 = arith.constant 0 : i32
    return %arg0, %arg1, %c0_i32 : i32, i32, i32
  }
  func.func @transform_11(%arg0: i32, %arg1: i32) -> (i32, i32, i32) {
    %c0_i32 = arith.constant 0 : i32
    %c0_i32_0 = arith.constant 0 : i32
    return %arg0, %arg1, %c0_i32 : i32, i32, i32
  }
}

</mosaic_0001>

<bundles_post_ra>
// kernel: tpu_custom_call.1
= control target key start
LH: loop header
LB: loop body
LE: loop exit
PB: predicated region body
PF: predicated region fallthrough
CT: control target
= control target key end

     0   :  { %s2009_s0 = inlined_call_operand.vmem [shape: bf16[2,16,32], index: 0, kind: input, shape index: {}]   ;;  %s2010_s1 = inlined_call_operand.vmem [shape: bf16[2,128,32], index: 1, kind: input, shape index: {}]   ;;  %s2011_s2 = inlined_call_operand.vmem [shape: f32[2,1,128], index: 2, kind: input, shape index: {}]   ;;  %s2012_s3 = inlined_call_operand.vmem [shape: f32[2,1,1], index: 3, kind: input, shape index: {}]   ;;  %s2013_s4 = inlined_call_operand.vmem [shape: bf16[32,32], index: 4, kind: input, shape index: {}]   ;;  %s2014_s5 = inlined_call_operand.vmem [shape: f32[1,32], index: 5, kind: input, shape index: {}]   ;;  %s2015_s6 = inlined_call_operand.vmem [shape: bf16[32,32], index: 6, kind: input, shape index: {}]   ;;  %s2016_s7 = inlined_call_operand.vmem [shape: f32[1,32], index: 7, kind: input, shape index: {}]   ;;  %s2017_s8 = inlined_call_operand.vmem [shape: bf16[32,32], index: 8, kind: input, shape index: {}]   ;;  %s2018_s9 = inlined_call_operand.vmem [shape: f32[1,32], index: 9, kind: input, shape index: {}]   ;;  %s2019_s10 = inlined_call_operand.hbm [shape: f32[2,16,32], index: 10, kind: output, shape index: {0}]   ;;  %s2020_s11 = inlined_call_operand.hbm [shape: f32[2,16,128], index: 11, kind: output, shape index: {1}]  }
   0x1   :  { %2022 = sst [smem:[#allocation10_spill]] %s2009_s0 }
   0x2   :  { %2023 = sst [smem:[#allocation11_spill]] %s2010_s1 }
   0x3   :  { %2024 = sst [smem:[#allocation12_spill]] %s2011_s2 }
   0x4   :  { %2025 = sst [smem:[#allocation13_spill]] %s2012_s3 }
   0x5   :  { %2026 = sst [smem:[#allocation14_spill]] %s2013_s4 }
   0x6   :  { %2027 = sst [smem:[#allocation15_spill]] %s2014_s5 }
   0x7   :  { %17 = vsyncpa [#allocation5], 0 }
   0x8   :  { %19 = vsyncpa [#allocation5 + $0x1], 0 }
   0x9   :  { %20 = vsyncpa [#allocation7], 0 }
   0xa   :  { %22 = vsyncpa [#allocation7 + $0x1], 0  ;;  %s1713_s17 = smov 0   ;;  %s1715_s18 = smov 0  }
   0xb   :  { %s1717_s19 = smov 0   ;;  %s1719_s20 = smov 0  }
   0xc   :  { %s1721_s21 = smov 0   ;;  %s1723_s22 = smov 0  }
   0xd LB: > { %s1263_s23 = sadd.s32 4294967295, %s1648_s22   ;;  %s1264_s24 = sadd.s32 4294967294, %s1648_s22   ;;  %s1648_s22 = sphi %s1723_s22, %s28_s22   ;;  %s1644_s21 = sphi %s1721_s21, %s2041_s21   ;;  %s1640_s20 = sphi %s1719_s20, %s2040_s20   ;;  %s1636_s19 = sphi %s1717_s19, %s2039_s19   ;;  %s1632_s18 = sphi %s1715_s18, %s2038_s18   ;;  %s1628_s17 = sphi %s1713_s17, %s2037_s17  }
   0xe   : > { %s40_s25 = sadd.s32 1, %s1644_s21  ;;  %s281_s26 = sadd.s32 1, %s1636_s19 }
   0xf   : > { %p42_p0 = scmp.ge.s32.totalorder %s40_s25, 2  ;;  %p291_p1 = scmp.ne.s32.totalorder %s1636_s19, %s1632_s18 }
  0x10   : > { %p292_p2 = scmp.eq.s32.totalorder %s1263_s23, 1  ;;  %p297_p3 = scmp.ne.s32.totalorder %s1632_s18, %s1628_s17 }
  0x11   : > { %s2043_s25 = smov (%p42_p0, %s40_s25), 0  ;;  %p298_p5 = scmp.eq.s32.totalorder %s1264_s24, 1 }
  0x12   : > { %p1753_p4 = por %p292_p2, %p291_p1  ;;  %s276_s28 = ssub.s32 %s1644_s21, %s2043_s25 }
  0x13   : > { %p1267_p6 = scmp.ge.s32.totalorder %s1648_s22, 1  ;;  %p279_p7 = scmp.eq.s32.totalorder %s276_s28, 0 }
  0x14   : > { %p1760_p8 = por %p298_p5, %p297_p3  ;;  %p395_p9 = scmp.lt.s32.totalorder %s1648_s22, 3 }
  0x15   : > { %s1766_s30 = scalar_select %p279_p7, %s1636_s19, %s281_s26  }
  0x16   : > { %p396_p10 = pnand %p1267_p6, %p395_p9 }
  0x17   : > { %p456_p11 = scmp.lt.s32.totalorder (!%p396_p10), %s1640_s20, 1  ;;  %s2030_s1 = sld [smem:[#allocation11_spill]] (!%p396_p10) }
  0x18   : > { %399 = sbr.rel (%p396_p10) target bundleno = 857 (0x359), region = 60  ;;  %s2031_s4 = sld [smem:[#allocation14_spill]] (!%p396_p10) }
  0x19   : > { %s2032_s0 = sld [smem:[#allocation10_spill]] (!%p396_p10) }
  0x1a   : > { %s2033_s3 = sld [smem:[#allocation13_spill]] (!%p396_p10) }
  0x1b   : > { %s2034_s5 = sld [smem:[#allocation15_spill]] (!%p396_p10) }
  0x1c   : > { %s2035_s2 = sld [smem:[#allocation12_spill]] (!%p396_p10) }
  0x1d   : > { %v1435_v0 = vld [vmem:[%s2015_s6 + $0x8] sm:$0xff]  ;;  %v1434_v1 = vld [vmem:[%s2015_s6] sm:$0xff]  ;;  %s1776_s16 = scalar_select %p456_p11, %s1640_s20, 1  ;;  %vm559_vm0 = vcmask 261120   ;;  %vm750_vm1 = vcmask 257024  }
  0x1e   : > { %590 = vmatpush.bf16.msra.mxu0 %v1435_v0  ;;  %1459 = vmatpush.bf16.msra.mxu2 %v1435_v0  ;;  %v1440_v8 = vld [vmem:[%s2031_s4 + $0x8] sm:$0xff]  ;;  %v1439_v9 = vld [vmem:[%s2031_s4] sm:$0xff] }
  0x1f   : > { %s1425_s23 = sshll.u32 %s1776_s16, 6  ;;  %s1424_s12 = sshll.u32 %s1776_s16, 3  ;;  %v1437_v13 = vld [vmem:[%s2017_s8 + $0x8] sm:$0xff]  ;;  %v1436_v14 = vld [vmem:[%s2017_s8] sm:$0xff] }
  0x20   : > { %s469_s28 = scalar_lea.vmem %s2030_s1, %s1425_s23  ;;  %s463_s1 = scalar_lea.vmem %s2032_s0, %s1424_s12  ;;  %691 = vmatpush.bf16.msra.mxu1 %v1437_v13  ;;  %v1810_v15 = vld [vmem:[%s2016_s7] ss:$0 sm:$0xff] }
  0x21   : > { %v1426_v2 = vld [vmem:[%s469_s28] sm:$0xff]  ;;  %v1432_v3 = vld [vmem:[%s469_s28 + $0x30] sm:$0xff]  ;;  %v1427_v4 = vld [vmem:[%s469_s28 + $0x8] sm:$0xff]  ;;  %s475_s26 = scalar_lea.vmem %s2033_s3, %s1776_s16  ;;  %s1457_s12 = sshll.u32 %s1640_s20, 4 }
  0x22   : > { %591 = vmatpush.bf16.msra.mxu0 %v1434_v1  ;;  %1460 = vmatpush.bf16.msra.mxu2 %v1434_v1  ;;  %v1433_v5 = vld [vmem:[%s469_s28 + $0x38] sm:$0xff]  ;;  %v1428_v6 = vld [vmem:[%s469_s28 + $0x10] sm:$0xff]  ;;  %v1438_v10 = vld [vmem:[%s463_s1] sm:$0xff] }
  0x23   : > { %v1429_v7 = vld [vmem:[%s469_s28 + $0x18] sm:$0xff]  ;;  %v1430_v11 = vld [vmem:[%s469_s28 + $0x20] sm:$0xff]  ;;  %v1431_v12 = vld [vmem:[%s469_s28 + $0x28] sm:$0xff] }
  0x24   : > { %692 = vmatpush.bf16.msra.mxu1 %v1436_v14 }
  0x25   : > { %1314 = vmatmul.msk.bf16.vlgmr.msra.gmra.mxu0 %vm559_vm0, %v1426_v2  ;;  %1320 = vmatmul.msk.bf16.vlgmr.msra.gmra.mxu2 %vm559_vm0, %v1432_v3 }
  0x26   : > { %836 = vmatpush.bf16.msrb.mxu2 %v1440_v8 }
  0x2a   : > { %837 = vmatpush.bf16.msrb.mxu2 %v1439_v9 }
  0x35   : > { %1315 = vmatmul.msk.bf16.gmra.mxu0 %vm559_vm0, %v1427_v4  ;;  %1321 = vmatmul.msk.bf16.gmra.mxu2 %vm559_vm0, %v1433_v5 }
  0x45   : > { %1316 = vmatmul.msk.bf16.gmra.mxu0 %vm559_vm0, %v1428_v6  ;;  %1350 = vmatmul.msk.bf16.vlgmr.msrb.gmra.mxu2 %vm559_vm0, %v1438_v10 }
  0x55   : > { %1317 = vmatmul.msk.bf16.gmra.mxu0 %vm559_vm0, %v1429_v7 }
  0x65   : > { %1318 = vmatmul.msk.bf16.gmra.mxu0 %vm559_vm0, %v1430_v11 }
  0x75   : > { %1319 = vmatmul.msk.bf16.gmra.mxu0 %vm559_vm0, %v1431_v12 }
  0xa2   : > { %v593_v16 = vpop.f32.mrf.mxu0 }
  0xa3   : > { %v594_v17 = vadd.f32 %v1810_v15, %v593_v16 }
  0xa5   : > { %v734_v18 = vpack.c.bf16 %v594_v17, %v594_v17 }
  0xa7   : > { %751 = vst.msk [vmem:[#allocation2] sm:$0xf] %vm750_vm1, %v734_v18 }
  0xa8   : > { %v623_v19 = vpop.f32.mrf.mxu2 }
  0xa9   : > { %v1815_v20 = vadd.f32 %v1810_v15, %v623_v19 }
  0xaa   : > { %v595_v21 = vpop.f32.mrf.mxu0 }
  0xab   : > { %v596_v22 = vadd.f32 %v1810_v15, %v595_v21  ;;  %v746_v23 = vpack.c.bf16 %v1815_v20, %v1815_v20 }
  0xad   : > { %v633_v24 = vpack.c.bf16 %v596_v22, %v594_v17  ;;  %v735_v25 = vpack.c.bf16 %v596_v22, %v596_v22  ;;  %763 = vst.msk [vmem:[#allocation2 + $0x30] sm:$0xf] %vm750_vm1, %v746_v23 }
  0xaf   : > { %752 = vst.msk [vmem:[#allocation2 + $0x4] sm:$0xf] %vm750_vm1, %v735_v25  ;;  %1330 = vmatmul.msk.bf16.vlgmr.msra.gmra.mxu1 %vm559_vm0, %v633_v24  ;;  %v1528_v24 = vld [vmem:[%s475_s26] ss:$0 sm:$0xff]  ;;  %s472_s26 = scalar_lea.vmem %s2035_s2, %s1776_s16  ;;  %s1943_s16 = sand.u32 1, %s1632_s18  }
  0xb0   : > { %v625_v26 = vpop.f32.mrf.mxu2  ;;  %s2021_s15 = sshll.u32 %s1943_s16, 4  ;;  %s1082_s14 = scalar_lea.sflag [#allocation7], %s1943_s16 }
  0xb1   : > { %v1824_v27 = vadd.f32 %v1810_v15, %v625_v26  ;;  %v1650_v26 = vmov 0   ;;  %s454_s23 = scalar_lea.vmem [#allocation6], %s2021_s15 }
  0xb2   : > { %v598_v28 = vpop.f32.mrf.mxu0  ;;  %1524 = vset.pattern.permute.xlu0 %v1650_v26  ;;  %s1115_s1 = sshll.u32 %s454_s23, 4  ;;  %s1116_s1 = int_to_ptr.vmem [resolvable:$true] %s1115_s1 }
  0xb3   : > { %v599_v29 = vadd.f32 %v1810_v15, %v598_v28  ;;  %v639_v30 = vpack.c.bf16 %v1824_v27, %v1815_v20  ;;  %v747_v31 = vpack.c.bf16 %v1824_v27, %v1824_v27  ;;  %v1526_v20 = vld [vmem:[%s2034_s5] ss:$0 sm:$0xff]  ;;  %952 = vperm.xlu0 %1524, %v1528_v24  }
  0xb4   : > { %v1897_v27 = vld [vmem:[%s2018_s9] ss:$0 sm:$0xff] }
  0xb5   : > { %v736_v32 = vpack.c.bf16 %v599_v29, %v599_v29  ;;  %764 = vst.msk [vmem:[#allocation2 + $0x34] sm:$0xf] %vm750_vm1, %v747_v31 }
  0xb6   : > { %v1441_v31 = vld [vmem:[#allocation2] sm:$0xff] }
  0xb7   : > { %753 = vst.msk [vmem:[#allocation2 + $0x8] sm:$0xf] %vm750_vm1, %v736_v32 }
  0xb8   : > { %v628_v33 = vpop.f32.mrf.mxu2 }
  0xb9   : > { %v1834_v34 = vadd.f32 %v1810_v15, %v628_v33 }
  0xba   : > { %v600_v35 = vpop.f32.mrf.mxu0 }
  0xbb   : > { %v601_v36 = vadd.f32 %v1810_v15, %v600_v35  ;;  %v748_v37 = vpack.c.bf16 %v1834_v34, %v1834_v34 }
  0xbc   : > { %v1447_v53 = vld [vmem:[#allocation2 + $0x30] sm:$0xff] }
  0xbd   : > { %v634_v38 = vpack.c.bf16 %v601_v36, %v599_v29  ;;  %v737_v39 = vpack.c.bf16 %v601_v36, %v601_v36  ;;  %765 = vst.msk [vmem:[#allocation2 + $0x38] sm:$0xf] %vm750_vm1, %v748_v37  ;;  %v929_v56 = vsel %vm559_vm0, %v1447_v53, 0  ;;  %v911_v36 = vsel %vm559_vm0, %v1441_v31, 0 }
  0xbf   : > { %754 = vst.msk [vmem:[#allocation2 + $0xc] sm:$0xf] %vm750_vm1, %v737_v39  ;;  %1331 = vmatmul.msk.bf16.gmra.mxu1 %vm559_vm0, %v634_v38 }
  0xc0   : > { %v630_v40 = vpop.f32.mrf.mxu2 }
  0xc1   : > { %v1843_v41 = vadd.f32 %v1810_v15, %v630_v40 }
  0xc2   : > { %v603_v42 = vpop.f32.mrf.mxu0 }
  0xc3   : > { %v604_v43 = vadd.f32 %v1810_v15, %v603_v42  ;;  %v640_v44 = vpack.c.bf16 %v1843_v41, %v1834_v34  ;;  %v749_v45 = vpack.c.bf16 %v1843_v41, %v1843_v41 }
  0xc5   : > { %v738_v46 = vpack.c.bf16 %v604_v43, %v604_v43  ;;  %766 = vst.msk [vmem:[#allocation2 + $0x3c] sm:$0xf] %vm750_vm1, %v749_v45 }
  0xc6   : > { %v1442_v22 = vld [vmem:[#allocation2 + $0x8] sm:$0xff] }
  0xc7   : > { %755 = vst.msk [vmem:[#allocation2 + $0x10] sm:$0xf] %vm750_vm1, %v738_v46  ;;  %v914_v25 = vsel %vm559_vm0, %v1442_v22, 0 }
  0xc8   : > { %v839_v19 = vpop.f32.mrf.mxu2 }
  0xc9   : > { %v840_v28 = vadd.f32 %v1526_v20, %v839_v19 }
  0xca   : > { %v605_v47 = vpop.f32.mrf.mxu0 }
  0xcb   : > { %v606_v48 = vadd.f32 %v1810_v15, %v605_v47  ;;  %v844_v33 = vpack.c.bf16 %v840_v28, %v840_v28 }
  0xcc   : > { %v1448_v49 = vld [vmem:[#allocation2 + $0x38] sm:$0xff] }
  0xcd   : > { %v635_v50 = vpack.c.bf16 %v606_v48, %v604_v43  ;;  %v739_v51 = vpack.c.bf16 %v606_v48, %v606_v48  ;;  %v932_v52 = vsel %vm559_vm0, %v1448_v49, 0  ;;  %v864_v37 = vunpack.c.l.b16 %v844_v33 }
  0xce   : > { %934 = vmatpush.bf16.xpose.msra.mxu3 %v932_v52 }
  0xcf   : > { %756 = vst.msk [vmem:[#allocation2 + $0x14] sm:$0xf] %vm750_vm1, %v739_v51  ;;  %1332 = vmatmul.msk.bf16.gmra.mxu1 %vm559_vm0, %v635_v50 }
  0xd0   : > { %v841_v23 = vpop.f32.mrf.mxu2 }
  0xd1   : > { %v842_v29 = vadd.f32 %v1526_v20, %v841_v23 }
  0xd2   : > { %v608_v54 = vpop.f32.mrf.mxu0 }
  0xd3   : > { %v609_v55 = vadd.f32 %v1810_v15, %v608_v54  ;;  %v845_v34 = vpack.c.bf16 %v842_v29, %v842_v29 }
  0xd5   : > { %v740_v57 = vpack.c.bf16 %v609_v55, %v609_v55  ;;  %v865_v38 = vunpack.c.l.b16 %v845_v34 }
  0xd6   : > { %935 = vmatpush.bf16.xpose.msra.mxu3 %v929_v56  ;;  %v1443_v18 = vld [vmem:[#allocation2 + $0x10] sm:$0xff] }
  0xd7   : > { %757 = vst.msk [vmem:[#allocation2 + $0x18] sm:$0xf] %vm750_vm1, %v740_v57  ;;  %v917_v21 = vsel %vm559_vm0, %v1443_v18, 0  ;;  %v866_v41 = vpack.c.b16 %v865_v38, %v864_v37 }
  0xda   : > { %v610_v58 = vpop.f32.mrf.mxu0 }
  0xdb   : > { %v611_v59 = vadd.f32 %v1810_v15, %v610_v58 }
  0xdd   : > { %v636_v60 = vpack.c.bf16 %v611_v59, %v609_v55  ;;  %v741_v61 = vpack.c.bf16 %v611_v59, %v611_v59 }
  0xdf   : > { %758 = vst.msk [vmem:[#allocation2 + $0x1c] sm:$0xf] %vm750_vm1, %v741_v61  ;;  %1333 = vmatmul.msk.bf16.gmra.mxu1 %vm559_vm0, %v636_v60 }
  0xe2   : > { %v613_v62 = vpop.f32.mrf.mxu0 }
  0xe3   : > { %v614_v63 = vadd.f32 %v1810_v15, %v613_v62 }
  0xe5   : > { %v742_v0 = vpack.c.bf16 %v614_v63, %v614_v63 }
  0xe7   : > { %759 = vst.msk [vmem:[#allocation2 + $0x20] sm:$0xf] %vm750_vm1, %v742_v0 }
  0xea   : > { %v615_v1 = vpop.f32.mrf.mxu0 }
  0xeb   : > { %v616_v2 = vadd.f32 %v1810_v15, %v615_v1 }
  0xed   : > { %v637_v3 = vpack.c.bf16 %v616_v2, %v614_v63  ;;  %v743_v4 = vpack.c.bf16 %v616_v2, %v616_v2 }
  0xef   : > { %760 = vst.msk [vmem:[#allocation2 + $0x24] sm:$0xf] %vm750_vm1, %v743_v4  ;;  %1334 = vmatmul.msk.bf16.gmra.mxu1 %vm559_vm0, %v637_v3 }
  0xf2   : > { %v618_v5 = vpop.f32.mrf.mxu0 }
  0xf3   : > { %v619_v6 = vadd.f32 %v1810_v15, %v618_v5 }
  0xf5   : > { %v744_v7 = vpack.c.bf16 %v619_v6, %v619_v6 }
  0xf6   : > { %v1445_v14 = vld [vmem:[#allocation2 + $0x20] sm:$0xff] }
  0xf7   : > { %761 = vst.msk [vmem:[#allocation2 + $0x28] sm:$0xf] %vm750_vm1, %v744_v7  ;;  %v923_v16 = vsel %vm559_vm0, %v1445_v14, 0 }
  0xfa   : > { %v620_v8 = vpop.f32.mrf.mxu0 }
  0xfb   : > { %v621_v9 = vadd.f32 %v1810_v15, %v620_v8  ;;  %v1444_v15 = vld [vmem:[#allocation2 + $0x18] sm:$0xff] }
  0xfc   : > { %v920_v17 = vsel %vm559_vm0, %v1444_v15, 0 }
  0xfd   : > { %v638_v10 = vpack.c.bf16 %v621_v9, %v619_v6  ;;  %v745_v11 = vpack.c.bf16 %v621_v9, %v621_v9 }
  0xff   : > { %762 = vst.msk [vmem:[#allocation2 + $0x2c] sm:$0xf] %vm750_vm1, %v745_v11  ;;  %1335 = vmatmul.msk.bf16.gmra.mxu1 %vm559_vm0, %v638_v10 }
 0x106   : > { %v1446_v12 = vld [vmem:[#allocation2 + $0x28] sm:$0xff] }
 0x107   : > { %v926_v13 = vsel %vm559_vm0, %v1446_v12, 0 }
 0x108   : > { %936 = vmatpush.bf16.xpose.msra.mxu3 %v926_v13 }
 0x10f   : > { %1336 = vmatmul.msk.bf16.gmra.mxu1 %vm559_vm0, %v639_v30 }
 0x110   : > { %937 = vmatpush.bf16.xpose.msra.mxu3 %v923_v16 }
 0x118   : > { %938 = vmatpush.bf16.xpose.msra.mxu3 %v920_v17 }
 0x11f   : > { %1337 = vmatmul.msk.bf16.gmra.mxu1 %vm559_vm0, %v640_v44 }
 0x120   : > { %939 = vmatpush.bf16.xpose.msra.mxu3 %v917_v21 }
 0x125   : > { %v953_v24 = vpop.permute.xlu0 %952 }
 0x128   : > { %940 = vmatpush.bf16.xpose.msra.mxu3 %v914_v25  ;;  %v1529_v25 = vld [vmem:[%s472_s26] ss:$0 sm:$0xff]  ;;  %s1114_s26 = scalar_lea.hbm %s2020_s11, %s1457_s12 }
 0x129   : > { %s1117_s13 = sshll.u32 %s1114_s26, 4  ;;  %s1118_s13 = int_to_ptr.hbm [resolvable:$true] %s1117_s13 }
 0x12a   : > { %s1552_s15 = sshra.s32 %s1118_s13, 4  ;;  %s1553_s15 = int_to_ptr.hbm [resolvable:$true] %s1552_s15 }
 0x12b   : > { %s1554_s0 = scalar_lea.hbm %s1553_s15, 16  ;;  %p1559_p1 = scmp.lt.s32.totalorder %s1553_s15, %s2020_s11 }
 0x12c   : > { %v694_v30 = vpop.f32.mrf.mxu1  ;;  %p1555_p12 = scmp.ne.s32.totalorder %s1553_s15, %s1554_s0 }
 0x12d   : > { %v695_v32 = vadd.f32 %v1897_v27, %v694_v30 }
 0x12e   : > { %p1556_p13 = pnand %p1555_p12, %p1753_p4 }
 0x12f   : > { %v767_v35 = vpack.c.bf16 %v695_v32, %v695_v32 }
 0x130   : > { %941 = vmatpush.bf16.xpose.msra.mxu3 %v911_v36  ;;  %p1557_p0 = pneg %p1556_p13 }
 0x131   : > { %783 = vst.msk [vmem:[#allocation3] sm:$0xf] %vm750_vm1, %v767_v35 }
 0x134   : > { %v696_v39 = vpop.f32.mrf.mxu1 }
 0x135   : > { %v697_v40 = vadd.f32 %v1897_v27, %v696_v39  ;;  %v973_v39 = vlaneseq }
 0x137   : > { %v768_v42 = vpack.c.bf16 %v697_v40, %v697_v40  ;;  %1383 = vmatmul.msk.bf16.vlgmr.msra.gmra.mxu3 %vm559_vm0, %v866_v41  ;;  %v974_v41 = vand.u32 127, %v973_v39 }
 0x139   : > { %784 = vst.msk [vmem:[#allocation3 + $0x4] sm:$0xf] %vm750_vm1, %v768_v42  ;;  %vm975_vm2 = vcmp.lt.s32.totalorder %v974_v41, 8 }
 0x13c   : > { %v699_v43 = vpop.f32.mrf.mxu1 }
 0x13d   : > { %v700_v44 = vadd.f32 %v1897_v27, %v699_v43 }
 0x13f   : > { %v769_v45 = vpack.c.bf16 %v700_v44, %v700_v44 }
 0x140   : > { %v1449_v36 = vld [vmem:[#allocation3] sm:$0xff] }
 0x141   : > { %785 = vst.msk [vmem:[#allocation3 + $0x8] sm:$0xf] %vm750_vm1, %v769_v45 }
 0x144   : > { %v701_v46 = vpop.f32.mrf.mxu1 }
 0x145   : > { %v702_v47 = vadd.f32 %v1897_v27, %v701_v46 }
 0x147   : > { %v770_v48 = vpack.c.bf16 %v702_v47, %v702_v47 }
 0x149   : > { %786 = vst.msk [vmem:[#allocation3 + $0xc] sm:$0xf] %vm750_vm1, %v770_v48 }
 0x14c   : > { %v704_v49 = vpop.f32.mrf.mxu1 }
 0x14d   : > { %v705_v50 = vadd.f32 %v1897_v27, %v704_v49 }
 0x14f   : > { %v771_v51 = vpack.c.bf16 %v705_v50, %v705_v50 }
 0x150   : > { %v1450_v35 = vld [vmem:[#allocation3 + $0x8] sm:$0xff] }
 0x151   : > { %787 = vst.msk [vmem:[#allocation3 + $0x10] sm:$0xf] %vm750_vm1, %v771_v51 }
 0x154   : > { %v706_v52 = vpop.f32.mrf.mxu1 }
 0x155   : > { %v707_v53 = vadd.f32 %v1897_v27, %v706_v52 }
 0x157   : > { %v772_v54 = vpack.c.bf16 %v707_v53, %v707_v53 }
 0x159   : > { %788 = vst.msk [vmem:[#allocation3 + $0x14] sm:$0xf] %vm750_vm1, %v772_v54 }
 0x15c   : > { %v709_v55 = vpop.f32.mrf.mxu1 }
 0x15d   : > { %v710_v56 = vadd.f32 %v1897_v27, %v709_v55 }
 0x15f   : > { %v773_v57 = vpack.c.bf16 %v710_v56, %v710_v56 }
 0x160   : > { %v1451_v33 = vld [vmem:[#allocation3 + $0x10] sm:$0xff] }
 0x161   : > { %789 = vst.msk [vmem:[#allocation3 + $0x18] sm:$0xf] %vm750_vm1, %v773_v57 }
 0x164   : > { %v711_v58 = vpop.f32.mrf.mxu1 }
 0x165   : > { %v712_v59 = vadd.f32 %v1897_v27, %v711_v58 }
 0x167   : > { %v774_v60 = vpack.c.bf16 %v712_v59, %v712_v59 }
 0x169   : > { %790 = vst.msk [vmem:[#allocation3 + $0x1c] sm:$0xf] %vm750_vm1, %v774_v60 }
 0x16c   : > { %v714_v61 = vpop.f32.mrf.mxu1 }
 0x16d   : > { %v715_v62 = vadd.f32 %v1897_v27, %v714_v61 }
 0x16f   : > { %v775_v63 = vpack.c.bf16 %v715_v62, %v715_v62 }
 0x170   : > { %v1452_v30 = vld [vmem:[#allocation3 + $0x18] sm:$0xff] }
 0x171   : > { %791 = vst.msk [vmem:[#allocation3 + $0x20] sm:$0xf] %vm750_vm1, %v775_v63 }
 0x174   : > { %v716_v0 = vpop.f32.mrf.mxu1 }
 0x175   : > { %v717_v1 = vadd.f32 %v1897_v27, %v716_v0 }
 0x177   : > { %v776_v2 = vpack.c.bf16 %v717_v1, %v717_v1 }
 0x179   : > { %792 = vst.msk [vmem:[#allocation3 + $0x24] sm:$0xf] %vm750_vm1, %v776_v2 }
 0x17c   : > { %v719_v3 = vpop.f32.mrf.mxu1 }
 0x17d   : > { %v720_v4 = vadd.f32 %v1897_v27, %v719_v3 }
 0x17f   : > { %v777_v5 = vpack.c.bf16 %v720_v4, %v720_v4 }
 0x180   : > { %v1453_v29 = vld [vmem:[#allocation3 + $0x20] sm:$0xff] }
 0x181   : > { %793 = vst.msk [vmem:[#allocation3 + $0x28] sm:$0xf] %vm750_vm1, %v777_v5 }
 0x184   : > { %v721_v6 = vpop.f32.mrf.mxu1 }
 0x185   : > { %v722_v7 = vadd.f32 %v1897_v27, %v721_v6 }
 0x187   : > { %v778_v8 = vpack.c.bf16 %v722_v7, %v722_v7 }
 0x189   : > { %794 = vst.msk [vmem:[#allocation3 + $0x2c] sm:$0xf] %vm750_vm1, %v778_v8 }
 0x18c   : > { %v724_v9 = vpop.f32.mrf.mxu1 }
 0x18d   : > { %v725_v10 = vadd.f32 %v1897_v27, %v724_v9 }
 0x18f   : > { %v779_v11 = vpack.c.bf16 %v725_v10, %v725_v10 }
 0x190   : > { %v1454_v23 = vld [vmem:[#allocation3 + $0x28] sm:$0xff] }
 0x191   : > { %795 = vst.msk [vmem:[#allocation3 + $0x30] sm:$0xf] %vm750_vm1, %v779_v11 }
 0x194   : > { %v726_v12 = vpop.f32.mrf.mxu1 }
 0x195   : > { %v727_v13 = vadd.f32 %v1897_v27, %v726_v12 }
 0x197   : > { %v780_v14 = vpack.c.bf16 %v727_v13, %v727_v13 }
 0x199   : > { %796 = vst.msk [vmem:[#allocation3 + $0x34] sm:$0xf] %vm750_vm1, %v780_v14 }
 0x19c   : > { %v729_v16 = vpop.f32.mrf.mxu1 }
 0x19d   : > { %v730_v15 = vadd.f32 %v1897_v27, %v729_v16 }
 0x19f   : > { %v781_v17 = vpack.c.bf16 %v730_v15, %v730_v15 }
 0x1a0   : > { %v1455_v20 = vld [vmem:[#allocation3 + $0x30] sm:$0xff] }
 0x1a1   : > { %797 = vst.msk [vmem:[#allocation3 + $0x38] sm:$0xf] %vm750_vm1, %v781_v17 }
 0x1a4   : > { %v731_v18 = vpop.f32.mrf.mxu1 }
 0x1a5   : > { %v732_v19 = vadd.f32 %v1897_v27, %v731_v18 }
 0x1a7   : > { %v782_v21 = vpack.c.bf16 %v732_v19, %v732_v19 }
 0x1a9   : > { %798 = vst.msk [vmem:[#allocation3 + $0x3c] sm:$0xf] %vm750_vm1, %v782_v21 }
 0x1b0   : > { %v1456_v22 = vld [vmem:[#allocation3 + $0x38] sm:$0xff] }
 0x1b1   : > { %1058 = vmatpush.bf16.msra.mxu2 %v1456_v22 }
 0x1b5   : > { %1059 = vmatpush.bf16.msra.mxu2 %v1455_v20 }
 0x1b9   : > { %1060 = vmatpush.bf16.msra.mxu2 %v1454_v23 }
 0x1ba   : > { %v943_v26 = vpop.f32.mrf.mxu3 }
 0x1bb   : > { %v955_v28 = vmul.f32 %v953_v24, %v943_v26 }
 0x1bd   : > { %1061 = vmatpush.bf16.msra.mxu2 %v1453_v29  ;;  %v961_v27 = vadd.f32 %v1529_v25, %v955_v28 }
 0x1bf   : > { %963 = vmax.xlane.f32.xlu0 %v961_v27 }
 0x1c1   : > { %1062 = vmatpush.bf16.msra.mxu2 %v1452_v30 }
 0x1c2   : > { %v945_v31 = vpop.f32.mrf.mxu3 }
 0x1c3   : > { %v956_v32 = vmul.f32 %v953_v24, %v945_v31 }
 0x1c5   : > { %1063 = vmatpush.bf16.msra.mxu2 %v1451_v33  ;;  %v962_v34 = vadd.f32 %v1529_v25, %v956_v32 }
 0x1c7   : > { %965 = vmax.xlane.f32.xlu1 %v962_v34 }
 0x1c9   : > { %1064 = vmatpush.bf16.msra.mxu2 %v1450_v35 }
 0x1cd   : > { %1065 = vmatpush.bf16.msra.mxu2 %v1449_v36 }
 0x232   : > { %v964_v37 = vpop.xlane.xlu0 %963 }
 0x233   : > { %v967_v38 = vsub.f32 %v961_v27, %v964_v37 }
 0x235   : > { %v969_v40 = vmul.f32 1.442695, %v967_v38 }
 0x237   : > { %1530 = vpow2.f32 %v969_v40 }
 0x23a   : > { %v966_v42 = vpop.xlane.xlu1 %965 }
 0x23b   : > { %v968_v43 = vsub.f32 %v962_v34, %v966_v42 }
 0x23d   : > { %v1531_v44 = vpop.eup %1530  ;;  %v971_v45 = vmul.f32 1.442695, %v968_v43 }
 0x23e   : > { %v976_v46 = vsel %vm975_vm2, %v1531_v44, 0.0 }
 0x23f   : > { %1532 = vpow2.f32 %v971_v45  ;;  %978 = vadd.xlane.f32.xlu1 %v976_v46 }
 0x245   : > { %v1533_v47 = vpop.eup %1532 }
 0x246   : > { %v977_v48 = vsel %vm975_vm2, %v1533_v47, 0.0 }
 0x247   : > { %980 = vadd.xlane.f32.xlu2 %v977_v48 }
 0x2b2   : > { %v979_v49 = vpop.xlane.xlu1 %978 }
 0x2b3   : > { %1534 = vrcp.f32 %v979_v49 }
 0x2b9   : > { %v1535_v50 = vpop.eup %1534 }
 0x2ba   : > { %v984_v51 = vmul.f32 %v1535_v50, %v976_v46  ;;  %v981_v52 = vpop.xlane.xlu2 %980 }
 0x2bb   : > { %1536 = vrcp.f32 %v981_v52 }
 0x2bc   : > { %1074 = vst [vmem:[%s454_s23] sm:$0xff] %v984_v51  ;;  %v986_v54 = vpack.c.bf16 %v984_v51, %v984_v51 }
 0x2be   : > { %v1006_v57 = vunpack.c.l.b16 %v986_v54 }
 0x2c1   : > { %v1537_v53 = vpop.eup %1536 }
 0x2c2   : > { %v985_v55 = vmul.f32 %v1537_v53, %v977_v48 }
 0x2c4   : > { %v987_v56 = vpack.c.bf16 %v985_v55, %v985_v55  ;;  %1075 = vst [vmem:[%s454_s23 + $0x8] sm:$0xff] %v985_v55  ;;  %s1558_s23 = scalar_lea.hbm %s2020_s11, 32 }
 0x2c5   : > { %p1560_p2 = scmp.lt.s32.totalorder %s1558_s23, %s1554_s0 }
 0x2c6   : > { %v1007_v58 = vunpack.c.l.b16 %v987_v56 }
 0x2c7   : > { %p1561_p3 = por %p1560_p2, %p1559_p1 }
 0x2c8   : > { %v1008_v59 = vpack.c.b16 %v1007_v58, %v1006_v57 }
 0x2c9   : > { %p1562_p5 = pnand %p1561_p3, %p1557_p0 }
 0x2ca   : > { %1066 = vmatmul.bf16.vlgmr.msra.gmra.mxu2 %v1008_v59 }
 0x2cb   : > { %1565 = shalt.err (!%p1562_p5)
}
 0x2cc   : > { %s1651_s28 = smov 128   ;;  %s1652_s24 = smov 8  }
 0x2cd   : > { %1462 = dma.vmem_to_hbm [thread:$0]  (%p1753_p4), %s1116_s1, 256, %s1118_s13, %s1082_s14, %s1651_s28, %s1651_s28, %s1652_s24  }
 0x2ce   : > { %s2036_s2 = sshll.u32 %s1943_s16, 4  ;;  %s1095_s15 = scalar_lea.hbm %s2019_s10, %s1457_s12 }
 0x2cf   : > { %s447_s3 = scalar_lea.vmem [#allocation4], %s2036_s2  ;;  %s1098_s23 = sshll.u32 %s1095_s15, 4  ;;  %s1099_s23 = int_to_ptr.hbm [resolvable:$true] %s1098_s23 }
 0x2d0   : > { %s1096_s26 = sshll.u32 %s447_s3, 4  ;;  %s1077_s20 = scalar_lea.sflag [#allocation5], %s1943_s16  ;;  %s1097_s26 = int_to_ptr.vmem [resolvable:$true] %s1096_s26 }
 0x2d1   : > { %s1580_s5 = sshra.s32 %s1099_s23, 4  ;;  %s1586_s2 = scalar_lea.hbm %s2019_s10, 32  ;;  %s1581_s5 = int_to_ptr.hbm [resolvable:$true] %s1580_s5 }
 0x2d2   : > { %s1582_s1 = scalar_lea.hbm %s1581_s5, 16  ;;  %p1587_p10 = scmp.lt.s32.totalorder %s1581_s5, %s2019_s10 }
 0x2d3   : > { %p1583_p6 = scmp.ne.s32.totalorder %s1581_s5, %s1582_s1  ;;  %p1588_p11 = scmp.lt.s32.totalorder %s1586_s2, %s1582_s1 }
 0x2d5   : > { %p1584_p7 = pnand %p1583_p6, %p1753_p4  ;;  %p1589_p12 = por %p1588_p11, %p1587_p10 }
 0x2d7   : > { %p1585_p9 = pneg %p1584_p7 }
 0x2d9   : > { %p1590_p13 = pnand %p1589_p12, %p1585_p9 }
 0x34d   : > { %v1067_v60 = vpop.f32.mrf.mxu2 }
 0x34e   : > { %1072 = vst.msk [vmem:[%s447_s3] sm:$0xff] %vm559_vm0, %v1067_v60 }
 0x355   : > { %v1069_v61 = vpop.f32.mrf.mxu2 }
 0x356   : > { %1073 = vst.msk [vmem:[%s447_s3 + $0x8] sm:$0xff] %vm559_vm0, %v1069_v61 }
 0x357   : > { %1593 = shalt.err (!%p1590_p13)
}
 0x358   : > { %1461 = dma.vmem_to_hbm [thread:$0]  (%p1753_p4), %s1097_s26, 256, %s1099_s23, %s1077_s20, %s1651_s28, %s1651_s28, %s1652_s24  }
 0x359 PF: > { %p1472_p0 = scmp.ge.s32.totalorder %s1648_s22, 2  ;;  %s1132_s16 = sand.u32 1, %s1628_s17  }
 0x35a   : > { %s1133_s5 = scalar_lea.sflag [#allocation5], %s1132_s16 }
 0x35b   : > { %p1466_p1 = pnand %p1472_p0, %p1760_p8 }
 0x35d   : > { %p1467_p2 = pneg %p1466_p1 }
 0x35f   : > { %1619 = dma.done.wait (%p1467_p2), %s1133_s5, 256  }
 0x360   : > { %1621 = vsyncadd (%p1467_p2), %s1133_s5, 4294967040  ;;  %s1143_s3 = scalar_lea.sflag [#allocation7], %s1132_s16 }
 0x361   : > { %1623 = dma.done.wait (%p1467_p2), %s1143_s3, 256  }
 0x362   : > { %1625 = vsyncadd (%p1467_p2), %s1143_s3, 4294967040  ;;  %s28_s22 = sadd.s32 1, %s1648_s22   ;;  %s2037_s17 = smov %s1632_s18 }
 0x363   : > { %p25_p3 = scmp.ge.s32.totalorder %s28_s22, 4   ;;  %s2038_s18 = smov %s1636_s19 }
 0x364   : > { %s2039_s19 = smov %s1766_s30  ;;  %s2040_s20 = smov %s1644_s21 }
 0x365   : > { %s2041_s21 = smov %s2043_s25  ;;  %27 = sbr.rel (!%p25_p3) target bundleno = 13 (0xd), region = 125 }
 0x36a   :  { %1149 = vsyncpa [#allocation5], 1 }
 0x36b   :  { %1151 = vsyncpa [#allocation5 + $0x1], 1 }
 0x36c   :  { %1152 = vsyncpa [#allocation7], 1 }
 0x36d   :  { %1154 = vsyncpa [#allocation7 + $0x1], 1 }

</bundles_post_ra>
